<compile_context>
chip_gen: v6e
topology: v6e:2x2x1
jax: 0.10.0
libtpu: 0.0.40
codegen_flags: <defaults>
</compile_context>

<pallas_src>
import jax
import jax.numpy as jnp
from jax import lax
from jax.experimental import pallas as pl
from jax.experimental.pallas import tpu as pltpu


TB = 128  # tokens per grid step (sublane-aligned, dense output tile)


def _round_up(x: int, m: int) -> int:
    return (x + m - 1) // m * m


def _embedding_kernel(ids_ref, e_ref, out_ref):
    # ids_ref : VMEM (TB, 1) int32      token ids for this block (pre-clamped)
    # e_ref   : VMEM (V_pad, D)         whole padded table (constant index_map)
    # out_ref : VMEM (TB, D)            gathered rows for this block
    ids = ids_ref[...]                                   # (TB, 1)
    tb = out_ref.shape[0]
    v_pad = e_ref.shape[0]

    # One-hot selection matrix built on the VPU (lane iota + compare), then a
    # single MXU matmul selects all TB rows at once.  HIGHEST precision keeps
    # the f32 table values exact (rows are selected, never blended).
    col = lax.broadcasted_iota(jnp.int32, (tb, v_pad), 1)  # (TB, V_pad)
    onehot = (col == ids).astype(e_ref.dtype)              # exact 0.0 / 1.0

    gathered = jnp.dot(
        onehot,
        e_ref[...],
        preferred_element_type=jnp.float32,
        precision=lax.Precision.HIGHEST,
    )
    out_ref[...] = gathered.astype(out_ref.dtype)


def embedding_lookup(token_ids: jax.Array, E: jax.Array, *, tb: int = TB) -> jax.Array:
    """token_ids: (B, S) int32; E: (V, D) float32 -> (B, S, D) float32."""
    B, S = token_ids.shape
    V, D = E.shape
    N = B * S

    # Pad the vocab (contraction dim of the one-hot matmul) to an MXU-friendly
    # multiple of 128; padded rows are zero and never selected.
    v_pad = _round_up(V, 128)
    E_pad = E if v_pad == V else jnp.pad(E, ((0, v_pad - V), (0, 0)))

    # Clamp ids (PyTorch would raise on OOB; VMEM indexing is unchecked) and pad
    # the token count to whole TB blocks (pad id 0 is valid; rows sliced off).
    n_pad = _round_up(N, tb)
    ids_flat = jnp.clip(token_ids.reshape(N).astype(jnp.int32), 0, V - 1)
    ids_pad = jnp.pad(ids_flat, (0, n_pad - N)).reshape(n_pad, 1)

    num_blocks = n_pad // tb

    # Explicit VMEM budget: resident table (possibly double-buffered by the
    # pipeline) + double-buffered ids/out blocks + slack.  Floor of 32 MiB
    # covers v5e's 16 MiB scoped default; cap at 48 MiB stays under v7x's
    # 64 MiB physical VMEM.
    itemsize = jnp.dtype(E_pad.dtype).itemsize
    table_bytes = v_pad * D * itemsize
    block_bytes = tb * D * itemsize + tb * 4
    vmem_limit = min(max(2 * table_bytes + 8 * block_bytes + (8 << 20), 32 << 20), 48 << 20)

    out_pad = pl.pallas_call(
        _embedding_kernel,
        out_shape=jax.ShapeDtypeStruct((n_pad, D), E.dtype),
        grid_spec=pltpu.PrefetchScalarGridSpec(
            num_scalar_prefetch=0,
            grid=(num_blocks,),
            in_specs=[
                # Token-id block for this grid step.
                pl.BlockSpec((tb, 1), lambda i: (i, 0)),
                # Whole padded table; constant index_map -> fetched once and
                # kept resident across the grid.
                pl.BlockSpec((v_pad, D), lambda i: (0, 0)),
            ],
            out_specs=pl.BlockSpec((tb, D), lambda i: (i, 0)),
        ),
        compiler_params=pltpu.CompilerParams(
            dimension_semantics=("parallel",),  # independent blocks: v7x dual-TC
            vmem_limit_bytes=int(vmem_limit),
        ),
    )(ids_pad, E_pad)

    return out_pad[:N].reshape(B, S, D)


if __name__ == "__main__":
    # Small shapes consistent with the module: vocab=32, embedding_dim=128,
    # token_ids of shape (batch=2, seq=8).
    num_embeddings = 32
    embedding_dim = 128
    B, S = 2, 8

    key = jax.random.PRNGKey(0)
    k_e, k_ids = jax.random.split(key)

    # Deterministic init matching nn.init.trunc_normal_(mean=0, std=1, a=-3, b=3)
    E = jax.random.truncated_normal(
        k_e, -3.0, 3.0, (num_embeddings, embedding_dim), dtype=jnp.float32
    )
    token_ids = jax.random.randint(
        k_ids, (B, S), minval=0, maxval=num_embeddings, dtype=jnp.int32
    )

    out = jax.block_until_ready(embedding_lookup(token_ids, E))

    # Reference check against plain JAX gather (same semantics as E[token_ids, :]).
    ref = E[token_ids, :]
    assert out.shape == (B, S, embedding_dim)
    assert jnp.allclose(out, ref), "mismatch vs reference gather"

    print("KERNEL_OK")
</pallas_src>

<mosaic_0001>
module attributes {stable_mosaic.version = 11 : i64} {
  func.func @_embedding_kernel(%arg0: i32, %arg1: memref<128x1xi32, #tpu.memory_space<vmem>>, %arg2: memref<128x128xf32, #tpu.memory_space<vmem>>, %arg3: memref<128x128xf32, #tpu.memory_space<vmem>>) attributes {dimension_semantics = [#tpu.dimension_semantics<parallel>], iteration_bounds = array<i64: 1>, scalar_prefetch = 0 : i64, scratch_operands = 0 : i64, tpu.core_type = #tpu.core_type<tc>, window_params = [{transform_indices = @transform_0, window_bounds = array<i64: 128, 1>}, {pipeline_mode = #tpu.pipeline_mode<synchronous>, transform_indices = @transform_1, window_bounds = array<i64: 128, 128>}, {transform_indices = @transform_2, window_bounds = array<i64: 128, 128>}]} {
    %c0 = arith.constant 0 : index
    %c0_0 = arith.constant 0 : index
    %0 = vector.load %arg1[%c0, %c0_0] : memref<128x1xi32, #tpu.memory_space<vmem>>, vector<128x1xi32>
    %1 = tpu.iota {dimensions = array<i32: 1>} : vector<128x128xi32>
    %2 = vector.broadcast %0 : vector<128x1xi32> to vector<128x128xi32>
    %3 = arith.cmpi eq, %1, %2 : vector<128x128xi32>
    %4 = arith.extui %3 : vector<128x128xi1> to vector<128x128xi32>
    %5 = arith.sitofp %4 : vector<128x128xi32> to vector<128x128xf32>
    %c0_1 = arith.constant 0 : index
    %c0_2 = arith.constant 0 : index
    %6 = vector.load %arg2[%c0_1, %c0_2] : memref<128x128xf32, #tpu.memory_space<vmem>>, vector<128x128xf32>
    %cst = arith.constant dense<0.000000e+00> : vector<128x128xf32>
    %7 = tpu.matmul %5, %6, %cst {dimension_numbers = #tpu.dot_dimension_numbers<[1], [0], [0], [1], [0, 0, 1, 1], [], []>, precision = #tpu.contract_precision<fp32>} : vector<128x128xf32>, vector<128x128xf32>, vector<128x128xf32> -> vector<128x128xf32>
    %c0_3 = arith.constant 0 : index
    %c0_4 = arith.constant 0 : index
    %8 = vector.load %arg3[%c0_3, %c0_4] : memref<128x128xf32, #tpu.memory_space<vmem>>, vector<128x128xf32>
    tpu.vector_store %arg3[%c0_3, %c0_4], %7 {strides = array<i32>} : memref<128x128xf32, #tpu.memory_space<vmem>>, vector<128x128xf32>,
    return
  }
  func.func @transform_0(%arg0: i32) -> (i32, i32) {
    %c0_i32 = arith.constant 0 : i32
    %c0_i32_0 = arith.constant 0 : i32
    return %arg0, %c0_i32 : i32, i32
  }
  func.func @transform_1(%arg0: i32) -> (i32, i32) {
    %c0_i32 = arith.constant 0 : i32
    %c0_i32_0 = arith.constant 0 : i32
    %c0_i32_1 = arith.constant 0 : i32
    return %c0_i32, %c0_i32_0 : i32, i32
  }
  func.func @transform_2(%arg0: i32) -> (i32, i32) {
    %c0_i32 = arith.constant 0 : i32
    %c0_i32_0 = arith.constant 0 : i32
    return %arg0, %c0_i32 : i32, i32
  }
}

</mosaic_0001>

<bundles_post_ra>
// kernel: tpu_custom_call.1
= control target key start
LH: loop header
LB: loop body
LE: loop exit
PB: predicated region body
PF: predicated region fallthrough
CT: control target
= control target key end

     0   :  { %v2082_v2 = vmov 0   ;;  %s3132_s0 = inlined_call_operand.vmem [shape: s32[128,1], index: 0, kind: input, shape index: {}]   ;;  %s3133_s1 = inlined_call_operand.vmem [shape: f32[128,128], index: 1, kind: input, shape index: {}]   ;;  %s3134_s2 = inlined_call_operand.hbm [shape: f32[128,128], index: 2, kind: output, shape index: {}]  }
   0x1   :  { %v14_v0 = vld [vmem:[%s3132_s0 + $0x10] sm:$0xff]  ;;  %v12_v1 = vld [vmem:[%s3132_s0] sm:$0xff]  ;;  %2059 = vset.pattern.permute.xlu1 %v2082_v2  ;;  %2058 = vset.pattern.permute.xlu0 %v2082_v2  ;;  %v15_v3 = vld [vmem:[%s3132_s0 + $0x18] sm:$0xff] }
   0x2   :  { %37 = vperm.xlu1 %2059, %v14_v0   ;;  %31 = vperm.xlu0 %2058, %v12_v1   ;;  %v13_v4 = vld [vmem:[%s3132_s0 + $0x8] sm:$0xff]  ;;  %v141_v5 = vld [vmem:[%s3133_s1 + $0x78] sm:$0xff]  ;;  %v140_v6 = vld [vmem:[%s3133_s1 + $0x70] sm:$0xff] }
   0x3   :  { %v2121_v7 = vand.u32 4294901760, %v141_v5  ;;  %v2123_v8 = vand.u32 4294901760, %v140_v6  ;;  %v139_v9 = vld [vmem:[%s3133_s1 + $0x68] sm:$0xff]  ;;  %v138_v10 = vld [vmem:[%s3133_s1 + $0x60] sm:$0xff]  ;;  %v137_v11 = vld [vmem:[%s3133_s1 + $0x58] sm:$0xff] }
   0x4   :  { %v17_v12 = vld [vmem:[%s3132_s0 + $0x28] sm:$0xff]  ;;  %v16_v13 = vld [vmem:[%s3132_s0 + $0x20] sm:$0xff]  ;;  %v2140_v14 = vand.u32 4294901760, %v139_v9  ;;  %v2142_v15 = vand.u32 4294901760, %v138_v10  ;;  %v2144_v16 = vand.u32 4294901760, %v137_v11  ;;  %v136_v17 = vld [vmem:[%s3133_s1 + $0x50] sm:$0xff] }
   0x5   :  { %v2150_v18 = vsub.f32 %v141_v5, %v2121_v7  ;;  %v2153_v19 = vsub.f32 %v140_v6, %v2123_v8  ;;  %1716 = vmatprep.subr.mxu0 %v2121_v7  ;;  %v135_v20 = vld [vmem:[%s3133_s1 + $0x48] sm:$0xff]  ;;  %v2166_v23 = vand.u32 4294901760, %v136_v17  ;;  %v134_v26 = vld [vmem:[%s3133_s1 + $0x40] sm:$0xff] }
   0x6   :  { %40 = vperm.xlu1 %2059, %v15_v3   ;;  %34 = vperm.xlu0 %2058, %v13_v4   ;;  %v2160_v21 = vsub.f32 %v139_v9, %v2140_v14  ;;  %v2163_v22 = vsub.f32 %v138_v10, %v2142_v15 }
   0x7   :  { %1717 = vmatpush3.msra.mxu0 %v2121_v7  ;;  %v2169_v24 = vand.u32 4294901760, %v2150_v18  ;;  %v2172_v25 = vand.u32 4294901760, %v2153_v19 }
   0xa   :  { %46 = vperm.xlu1 %2059, %v17_v12   ;;  %43 = vperm.xlu0 %2058, %v16_v13  }
   0xb   :  { %7 = vsyncpa [#allocation3], 0  ;;  %v19_v27 = vld [vmem:[%s3132_s0 + $0x38] sm:$0xff]  ;;  %v18_v28 = vld [vmem:[%s3132_s0 + $0x30] sm:$0xff]  ;;  %v2184_v29 = vand.u32 4294901760, %v2160_v21  ;;  %v2187_v30 = vsub.f32 %v137_v11, %v2144_v16  ;;  %1718 = vmatprep.subr.mxu0 %v2123_v8  ;;  %v2190_v31 = vand.u32 4294901760, %v135_v20  ;;  %v387_v32 = vsub.f32 %v2150_v18, %v2169_v24 }
   0xc   :  { %v394_v33 = vsub.f32 %v2153_v19, %v2172_v25  ;;  %v2197_v34 = vand.u32 4294901760, %v2163_v22  ;;  %1719 = vmatpush3.msra.mxu0 %v2123_v8  ;;  %v2203_v36 = vsub.f32 %v136_v17, %v2166_v23  ;;  %v2206_v37 = vand.u32 4294901760, %v134_v26  ;;  %v133_v38 = vld [vmem:[%s3133_s1 + $0x38] sm:$0xff]  ;;  %v21_v40 = vld [vmem:[%s3132_s0 + $0x48] sm:$0xff]  ;;  %v20_v41 = vld [vmem:[%s3132_s0 + $0x40] sm:$0xff] }
   0xd   :  { %v401_v35 = vsub.f32 %v2160_v21, %v2184_v29  ;;  %1720 = vmatprep.subr.mxu0 %v2140_v14  ;;  %v388_v39 = vand.u32 4294901760, %v387_v32  ;;  %v2218_v43 = vand.u32 4294901760, %v2187_v30  ;;  %v2221_v44 = vsub.f32 %v135_v20, %v2190_v31  ;;  %v132_v45 = vld [vmem:[%s3133_s1 + $0x30] sm:$0xff]  ;;  %v131_v51 = vld [vmem:[%s3133_s1 + $0x28] sm:$0xff]  ;;  %v23_v53 = vld [vmem:[%s3132_s0 + $0x58] sm:$0xff] }
   0xe   :  { %52 = vperm.xlu1 %2059, %v19_v27   ;;  %49 = vperm.xlu0 %2058, %v18_v28   ;;  %v395_v42 = vand.u32 4294901760, %v394_v33  ;;  %v408_v46 = vsub.f32 %v2163_v22, %v2197_v34  ;;  %v2230_v47 = vand.u32 4294901760, %v133_v38  ;;  %v2233_v49 = vand.u32 4294901760, %v2203_v36  ;;  %v22_v54 = vld [vmem:[%s3132_s0 + $0x50] sm:$0xff]  ;;  %v130_v57 = vld [vmem:[%s3133_s1 + $0x20] sm:$0xff]  ;;  %v129_v63 = vld [vmem:[%s3133_s1 + $0x18] sm:$0xff] }
   0xf   :  { %1721 = vmatpush3.msra.mxu0 %v2140_v14  ;;  %1772 = vmatprep.subr.mxu1 %v388_v39  ;;  %v402_v48 = vand.u32 4294901760, %v401_v35  ;;  %v2236_v50 = vsub.f32 %v134_v26, %v2206_v37  ;;  %v2242_v52 = vand.u32 4294901760, %v132_v45  ;;  %v415_v55 = vsub.f32 %v2187_v30, %v2218_v43  ;;  %v25_v2 = vld [vmem:[%s3132_s0 + $0x68] sm:$0xff]  ;;  %v24_v3 = vld [vmem:[%s3132_s0 + $0x60] sm:$0xff]  ;;  %v128_v6 = vld [vmem:[%s3133_s1 + $0x10] sm:$0xff] }
  0x10   :  { %1722 = vmatprep.subr.mxu0 %v2142_v15  ;;  %1773 = vmatpush3.msra.mxu1 %v388_v39  ;;  %v2253_v56 = vand.u32 4294901760, %v2221_v44  ;;  %v409_v58 = vand.u32 4294901760, %v408_v46  ;;  %v2260_v59 = vsub.f32 %v133_v38, %v2230_v47  ;;  %v2263_v60 = vand.u32 4294901760, %v131_v51  ;;  %v127_v17 = vld [vmem:[%s3133_s1 + $0x8] sm:$0xff]  ;;  %v27_v28 = vld [vmem:[%s3132_s0 + $0x78] sm:$0xff]  ;;  %v26_v32 = vld [vmem:[%s3132_s0 + $0x70] sm:$0xff] }
  0x11   :  { %1723 = vmatpush3.msra.mxu0 %v2142_v15  ;;  %1774 = vmatprep.subr.mxu1 %v395_v42  ;;  %v422_v61 = vsub.f32 %v2203_v36, %v2233_v49  ;;  %v2268_v62 = vand.u32 4294901760, %v2236_v50  ;;  %v2275_v0 = vsub.f32 %v132_v45, %v2242_v52  ;;  %v2277_v1 = vand.u32 4294901760, %v130_v57  ;;  %v126_v35 = vld [vmem:[%s3133_s1] sm:$0xff]  ;;  %s2085_s0 = smov [#allocation2]  }
  0x12   :  { %58 = vperm.xlu1 %2059, %v21_v40   ;;  %55 = vperm.xlu0 %2058, %v20_v41   ;;  %v416_v4 = vand.u32 4294901760, %v415_v55  ;;  %v429_v5 = vsub.f32 %v2221_v44, %v2253_v56  ;;  %v2292_v9 = vand.u32 4294901760, %v2260_v59  ;;  %v2296_v10 = vsub.f32 %v131_v51, %v2263_v60  ;;  %s1449_s1 = sshll.u32 %s2085_s0, 4  ;;  %s1450_s1 = int_to_ptr.vmem [resolvable:$true] %s1449_s1 }
  0x13   :  { %1724 = vmatprep.subr.mxu0 %v2144_v16  ;;  %1775 = vmatpush3.msra.mxu1 %v395_v42  ;;  %v2298_v11 = vand.u32 4294901760, %v129_v63  ;;  %v423_v12 = vand.u32 4294901760, %v422_v61  ;;  %v436_v13 = vsub.f32 %v2236_v50, %v2268_v62  ;;  %v2307_v20 = vand.u32 4294901760, %v2275_v0  ;;  %s2060_s17 = scalar_lea.vmem %s1450_s1, 2048  ;;  %p2065_p1 = scmp.lt.s32.totalorder %s1450_s1, %s1450_s1 }
  0x14   :  { %1725 = vmatpush3.msra.mxu0 %v2144_v16  ;;  %1776 = vmatprep.subr.mxu1 %v402_v48  ;;  %v2310_v26 = vsub.f32 %v130_v57, %v2277_v1  ;;  %v2312_v27 = vand.u32 4294901760, %v128_v6  ;;  %v430_v33 = vand.u32 4294901760, %v429_v5  ;;  %v443_v38 = vsub.f32 %v2260_v59, %v2292_v9  ;;  %p2061_p0 = scmp.ne.s32.totalorder %s1450_s1, %s2060_s17  ;;  %p2066_p2 = scmp.lt.s32.totalorder %s2060_s17, %s2060_s17 }
  0x15   :  { %1726 = vmatprep.subr.mxu0 %v2166_v23  ;;  %1777 = vmatpush3.msra.mxu1 %v402_v48  ;;  %3184 = vst [vmem:[#allocation5_spill] sm:$0xff] %v2307_v20  ;;  %v2327_v39 = vand.u32 4294901760, %v2296_v10  ;;  %v2331_v40 = vsub.f32 %v129_v63, %v2298_v11  ;;  %v2333_v41 = vand.u32 4294901760, %v127_v17  ;;  %v437_v42 = vand.u32 4294901760, %v436_v13 }
  0x16   :  { %64 = vperm.xlu1 %2059, %v23_v53   ;;  %61 = vperm.xlu0 %2058, %v22_v54   ;;  %v450_v45 = vsub.f32 %v2275_v0, %v2307_v20  ;;  %v2339_v46 = vand.u32 4294901760, %v2310_v26  ;;  %v2342_v48 = vsub.f32 %v128_v6, %v2312_v27  ;;  %v2344_v51 = vand.u32 4294901760, %v126_v35  ;;  %p2067_p3 = por %p2066_p2, %p2065_p1 }
  0x17   :  { %1727 = vmatpush3.msra.mxu0 %v2166_v23  ;;  %1778 = vmatprep.subr.mxu1 %v409_v58  ;;  %3185 = vst [vmem:[#allocation6_spill] sm:$0xff] %v2327_v39  ;;  %v444_v53 = vand.u32 4294901760, %v443_v38  ;;  %v457_v54 = vsub.f32 %v2296_v10, %v2327_v39  ;;  %v2350_v55 = vand.u32 4294901760, %v2331_v40  ;;  %v2354_v57 = vsub.f32 %v127_v17, %v2333_v41 }
  0x18   :  { %1728 = vmatprep.subr.mxu0 %v2190_v31  ;;  %1779 = vmatpush3.msra.mxu1 %v409_v58  ;;  %3186 = vst [vmem:[#allocation7_spill] sm:$0xff] %v2339_v46  ;;  %v451_v58 = vand.u32 4294901760, %v450_v45  ;;  %v464_v61 = vsub.f32 %v2310_v26, %v2339_v46  ;;  %v2360_v63 = vand.u32 4294901760, %v2342_v48  ;;  %p2068_p4 = pnand %p2067_p3, %p2061_p0 }
  0x19   :  { %1729 = vmatpush3.msra.mxu0 %v2190_v31  ;;  %1780 = vmatprep.subr.mxu1 %v416_v4  ;;  %3187 = vst [vmem:[#allocation8_spill] sm:$0xff] %v2350_v55  ;;  %v2370_v5 = vand.u32 4294901760, %v2354_v57 }
  0x1a   :  { %70 = vperm.xlu1 %2059, %v25_v2   ;;  %67 = vperm.xlu0 %2058, %v24_v3   ;;  %3188 = vst [vmem:[#allocation9_spill] sm:$0xff] %v2360_v63  ;;  %v2364_v2 = vsub.f32 %v126_v35, %v2344_v51  ;;  %v458_v3 = vand.u32 4294901760, %v457_v54  ;;  %v465_v6 = vand.u32 4294901760, %v464_v61 }
  0x1b   :  { %1730 = vmatprep.subr.mxu0 %v2206_v37  ;;  %1781 = vmatpush3.msra.mxu1 %v416_v4  ;;  %v471_v4 = vsub.f32 %v2331_v40, %v2350_v55  ;;  %3189 = vst [vmem:[#allocation10_spill] sm:$0xff] %v2370_v5 }
  0x1c   :  { %1731 = vmatpush3.msra.mxu0 %v2206_v37  ;;  %1782 = vmatprep.subr.mxu1 %v423_v12  ;;  %v2377_v13 = vand.u32 4294901760, %v2364_v2 }
  0x1d   :  { %1732 = vmatprep.subr.mxu0 %v2230_v47  ;;  %1783 = vmatpush3.msra.mxu1 %v423_v12  ;;  %v478_v12 = vsub.f32 %v2342_v48, %v2360_v63  ;;  %v472_v17 = vand.u32 4294901760, %v471_v4  ;;  %v3137_v4 = vmov 1.0  }
  0x1e   :  { %76 = vperm.xlu1 %2059, %v27_v28   ;;  %73 = vperm.xlu0 %2058, %v26_v32   ;;  %3190 = vst [vmem:[#allocation11_spill] sm:$0xff] %v2377_v13  ;;  %v485_v28 = vsub.f32 %v2354_v57, %v2370_v5  ;;  %v3198_v5 = vmov 1.0  }
  0x1f   :  { %1733 = vmatpush3.msra.mxu0 %v2230_v47  ;;  %1784 = vmatprep.subr.mxu1 %v430_v33  ;;  %v479_v32 = vand.u32 4294901760, %v478_v12 }
  0x20   :  { %1734 = vmatprep.subr.mxu0 %v2242_v52  ;;  %1785 = vmatpush3.msra.mxu1 %v430_v33  ;;  %v492_v33 = vsub.f32 %v2364_v2, %v2377_v13  ;;  %v486_v35 = vand.u32 4294901760, %v485_v28 }
  0x21   :  { %1735 = vmatpush3.msra.mxu0 %v2242_v52  ;;  %1786 = vmatprep.subr.mxu1 %v437_v42 }
  0x22   :  { %1736 = vmatprep.subr.mxu0 %v2263_v60  ;;  %1787 = vmatpush3.msra.mxu1 %v437_v42  ;;  %v493_v38 = vand.u32 4294901760, %v492_v33  ;;  %v28_v42 = vlaneseq }
  0x23   :  { %1737 = vmatpush3.msra.mxu0 %v2263_v60  ;;  %1788 = vmatprep.subr.mxu1 %v444_v53 }
  0x24   :  { %1738 = vmatprep.subr.mxu0 %v2277_v1  ;;  %1789 = vmatpush3.msra.mxu1 %v444_v53  ;;  %v2393_v45 = vand.u32 127, %v28_v42 }
  0x25   :  { %1739 = vmatpush3.msra.mxu0 %v2277_v1  ;;  %1790 = vmatprep.subr.mxu1 %v451_v58 }
  0x26   :  { %1740 = vmatprep.subr.mxu0 %v2298_v11  ;;  %1791 = vmatpush3.msra.mxu1 %v451_v58  ;;  %v3135_v58 = vmov 0.0  }
  0x27   :  { %1741 = vmatpush3.msra.mxu0 %v2298_v11  ;;  %1792 = vmatprep.subr.mxu1 %v458_v3 }
  0x28   :  { %1742 = vmatprep.subr.mxu0 %v2312_v27  ;;  %1793 = vmatpush3.msra.mxu1 %v458_v3 }
  0x29   :  { %1743 = vmatpush3.msra.mxu0 %v2312_v27  ;;  %1794 = vmatprep.subr.mxu1 %v465_v6 }
  0x2a   :  { %1744 = vmatprep.subr.mxu0 %v2333_v41  ;;  %1795 = vmatpush3.msra.mxu1 %v465_v6 }
  0x2b   :  { %1745 = vmatpush3.msra.mxu0 %v2333_v41  ;;  %1796 = vmatprep.subr.mxu1 %v472_v17 }
  0x2c   :  { %1746 = vmatprep.subr.mxu0 %v2344_v51  ;;  %1797 = vmatpush3.msra.mxu1 %v472_v17 }
  0x2d   :  { %1747 = vmatpush3.msra.mxu0 %v2344_v51  ;;  %1798 = vmatprep.subr.mxu1 %v479_v32 }
  0x2e   :  { %1828 = vmatprep.subr.mxu0 %v2150_v18  ;;  %1799 = vmatpush3.msra.mxu1 %v479_v32 }
  0x2f   :  { %1800 = vmatprep.subr.mxu1 %v486_v35 }
  0x30   :  { %1801 = vmatpush3.msra.mxu1 %v486_v35 }
  0x31   :  { %1802 = vmatprep.subr.mxu1 %v493_v38 }
  0x32   :  { %1803 = vmatpush3.msra.mxu1 %v493_v38 }
  0x33   :  { %1884 = vmatprep.subr.mxu1 %v2121_v7 }
  0x7d   :  { %v2395_v53 = vpop.permute.xlu1 %37  ;;  %v2397_v54 = vpop.permute.xlu0 %31 }
  0x7e   :  { %3191 = vst [vmem:[#allocation12_spill] sm:$0xff] %v2395_v53  ;;  %3192 = vst [vmem:[#allocation13_spill] sm:$0xff] %v2397_v54  ;;  %vm80_vm0 = vcmp.eq.s32.totalorder %v2393_v45, %v2395_v53  ;;  %vm78_vm1 = vcmp.eq.s32.totalorder %v2393_v45, %v2397_v54 }
  0x7f   :  { %v1462_v61 = vsel %vm80_vm0, 1.0, %v3135_v58  ;;  %v1460_v3 = vsel %vm78_vm1, 1.0, %v3135_v58  ;;  %1804 = vmatprep.mubr.msk.f32.mxu1 %vm78_vm1, %v3137_v4 }
  0x80   :  { %v2415_v6 = vsub.f32 %v1460_v3, %v1460_v3  ;;  %v2417_v12 = vsub.f32 %v1462_v61, %v1462_v61 }
  0x81   :  { %v2419_v17 = vpop.permute.xlu1 %40  ;;  %v2421_v28 = vpop.permute.xlu0 %34 }
  0x82   :  { %3193 = vst [vmem:[#allocation14_spill] sm:$0xff] %v2419_v17  ;;  %3194 = vst [vmem:[#allocation15_spill] sm:$0xff] %v2421_v28  ;;  %vm81_vm2 = vcmp.eq.s32.totalorder %v2393_v45, %v2419_v17  ;;  %vm79_vm3 = vcmp.eq.s32.totalorder %v2393_v45, %v2421_v28  ;;  %v3139_v32 = vand.u32 4294901760, %v2415_v6  ;;  %v3201_v28 = vand.u32 4294901760, %v2417_v12 }
  0x83   :  { %v1463_v33 = vsel %vm81_vm2, 1.0, %v3135_v58  ;;  %v1461_v35 = vsel %vm79_vm3, 1.0, %v3135_v58  ;;  %1805 = vmatmul.mubr.msk.f32.vlgmr.msra.gmra.mxu1 %vm79_vm3, %v3137_v4 }
  0x84   :  { %v2440_v38 = vsub.f32 %v1461_v35, %v1461_v35  ;;  %1807 = vmatprep.mubr.msk.f32.mxu1 %vm80_vm0, %v3137_v4  ;;  %1885 = vmatpush3.msra.mxu1 %v2121_v7  ;;  %v226_v42 = vsub.f32 %v2415_v6, %v3139_v32  ;;  %v2450_v61 = vsub.f32 %v1463_v33, %v1463_v33  ;;  %v3197_v32 = vmov 0.0  }
  0x85   :  { %v2452_v3 = vpop.permute.xlu1 %46  ;;  %1886 = vmatprep.subr.mxu1 %v2123_v8  ;;  %v2455_v58 = vpop.permute.xlu0 %43 }
  0x86   :  { %3195 = vst [vmem:[#allocation16_spill] sm:$0xff] %v2452_v3  ;;  %3196 = vst [vmem:[#allocation17_spill] sm:$0xff] %v2455_v58  ;;  %vm83_vm4 = vcmp.eq.s32.totalorder %v2393_v45, %v2452_v3  ;;  %vm82_vm5 = vcmp.eq.s32.totalorder %v2393_v45, %v2455_v58  ;;  %1887 = vmatpush3.msra.mxu1 %v2123_v8  ;;  %v227_v4 = vand.u32 4294901760, %v226_v42  ;;  %v3152_v33 = vand.u32 4294901760, %v2440_v38 }
  0x87   :  { %v1464_v13 = vsel %vm82_vm5, 1.0, %v3197_v32  ;;  %1808 = vmatmul.mubr.msk.f32.gmra.mxu1 %vm81_vm2, %v3198_v5  ;;  %1888 = vmatprep.subr.mxu1 %v2140_v14  ;;  %v1465_v35 = vsel %vm83_vm4, 1.0, %v3197_v32  ;;  %v3204_v3 = vand.u32 4294901760, %v2450_v61 }
  0x88   :  { %v2477_v42 = vsub.f32 %v1464_v13, %v1464_v13  ;;  %1748 = vmatprep.mubr.f32.mxu0 %v227_v4  ;;  %1810 = vmatprep.mubr.msk.f32.mxu1 %vm82_vm5, %v3198_v5  ;;  %v236_v17 = vsub.f32 %v2440_v38, %v3152_v33  ;;  %v246_v13 = vsub.f32 %v2417_v12, %v3201_v28 }
  0x89   :  { %1889 = vmatpush3.msra.mxu1 %v2140_v14  ;;  %v2487_v63 = vpop.permute.xlu1 %52  ;;  %v2489_v53 = vpop.permute.xlu0 %49  ;;  %v2501_v55 = vsub.f32 %v1465_v35, %v1465_v35  ;;  %v256_v46 = vsub.f32 %v2450_v61, %v3204_v3 }
  0x8a   :  { %3199 = vst [vmem:[#allocation18_spill] sm:$0xff] %v2487_v63  ;;  %3200 = vst [vmem:[#allocation19_spill] sm:$0xff] %v2489_v53  ;;  %vm85_vm6 = vcmp.eq.s32.totalorder %v2393_v45, %v2487_v63  ;;  %1890 = vmatprep.subr.mxu1 %v2142_v15  ;;  %vm84_vm7 = vcmp.eq.s32.totalorder %v2393_v45, %v2489_v53  ;;  %v237_v33 = vand.u32 4294901760, %v236_v17  ;;  %v3205_v54 = vand.u32 4294901760, %v2477_v42 }
  0x8b   :  { %v1466_v28 = vsel %vm84_vm7, 1.0, %v3197_v32  ;;  %1891 = vmatpush3.msra.mxu1 %v2142_v15  ;;  %v1467_v17 = vsel %vm85_vm6, 1.0, %v3197_v32 }
  0x8c   :  { %v2508_v4 = vsub.f32 %v1466_v28, %v1466_v28  ;;  %1811 = vmatmul.mubr.msk.f32.gmra.mxu1 %vm83_vm4, %v3198_v5  ;;  %1892 = vmatprep.subr.mxu1 %v2144_v16  ;;  %v247_v28 = vand.u32 4294901760, %v246_v13  ;;  %v266_v39 = vsub.f32 %v2477_v42, %v3205_v54  ;;  %v2544_v54 = vsub.f32 %v1467_v17, %v1467_v17 }
  0x8d   :  { %1749 = vmatmul.mubr.f32.vlgmr.msra.gmra.mxu0 %v237_v33  ;;  %1813 = vmatprep.mubr.msk.f32.mxu1 %vm84_vm7, %v3198_v5  ;;  %v2523_v35 = vpop.permute.xlu1 %58  ;;  %v2525_v58 = vpop.permute.xlu0 %55 }
  0x8e   :  { %3202 = vst [vmem:[#allocation20_spill] sm:$0xff] %v2523_v35  ;;  %3203 = vst [vmem:[#allocation21_spill] sm:$0xff] %v2525_v58  ;;  %1829 = vmatpush3.msra.mxu0 %v2150_v18  ;;  %1893 = vmatpush3.msra.mxu1 %v2144_v16  ;;  %vm86_vm8 = vcmp.eq.s32.totalorder %v2393_v45, %v2525_v58  ;;  %v3173_v13 = vand.u32 4294901760, %v2508_v4  ;;  %vm87_vm9 = vcmp.eq.s32.totalorder %v2393_v45, %v2523_v35 }
  0x8f   :  { %1751 = vmatprep.mubr.f32.mxu0 %v247_v28  ;;  %1830 = vmatprep.subr.mxu0 %v2153_v19  ;;  %v1468_v33 = vsel %vm86_vm8, 1.0, %v3197_v32  ;;  %v257_v28 = vand.u32 4294901760, %v256_v46  ;;  %v267_v53 = vand.u32 4294901760, %v266_v39  ;;  %v3207_v46 = vand.u32 4294901760, %v2501_v55 }
  0x90   :  { %1894 = vmatprep.subr.mxu1 %v2166_v23  ;;  %1831 = vmatpush3.msra.mxu0 %v2153_v19  ;;  %v2550_v18 = vsub.f32 %v1468_v33, %v1468_v33  ;;  %v1469_v19 = vsel %vm87_vm9, 1.0, %v3197_v32  ;;  %v286_v33 = vsub.f32 %v2508_v4, %v3173_v13  ;;  %v3174_v58 = vand.u32 4294901760, %v2544_v54 }
  0x91   :  { %1895 = vmatpush3.msra.mxu1 %v2166_v23  ;;  %1832 = vmatprep.subr.mxu0 %v2160_v21  ;;  %v2554_v3 = vpop.permute.xlu0 %61  ;;  %v2571_v39 = vpop.permute.xlu1 %64  ;;  %v276_v17 = vsub.f32 %v2501_v55, %v3207_v46  ;;  %v2590_v20 = vsub.f32 %v1469_v19, %v1469_v19 }
  0x92   :  { %3206 = vst [vmem:[#allocation22_spill] sm:$0xff] %v2554_v3  ;;  %1814 = vmatmul.mubr.msk.f32.gmra.mxu1 %vm85_vm6, %v3198_v5  ;;  %1896 = vmatprep.subr.mxu1 %v2190_v31  ;;  %vm88_vm10 = vcmp.eq.s32.totalorder %v2393_v45, %v2554_v3  ;;  %v3175_v46 = vand.u32 4294901760, %v2550_v18  ;;  %vm89_vm11 = vcmp.eq.s32.totalorder %v2393_v45, %v2571_v39  ;;  %v287_v13 = vand.u32 4294901760, %v286_v33 }
  0x93   :  { %1752 = vmatmul.mubr.f32.gmra.mxu0 %v257_v28  ;;  %1816 = vmatprep.mubr.msk.f32.mxu1 %vm86_vm8, %v3198_v5  ;;  %v1470_v28 = vsel %vm88_vm10, 1.0, %v3197_v32  ;;  %v1471_v19 = vsel %vm89_vm11, 1.0, %v3197_v32 }
  0x94   :  { %1833 = vmatpush3.msra.mxu0 %v2160_v21  ;;  %1897 = vmatpush3.msra.mxu1 %v2190_v31  ;;  %v2596_v21 = vsub.f32 %v1470_v28, %v1470_v28  ;;  %v2634_v3 = vsub.f32 %v1471_v19, %v1471_v19 }
  0x95   :  { %1754 = vmatprep.mubr.f32.mxu0 %v267_v53  ;;  %1834 = vmatprep.subr.mxu0 %v2163_v22  ;;  %v2587_v63 = vpop.permute.xlu0 %67  ;;  %v277_v53 = vand.u32 4294901760, %v276_v17  ;;  %v306_v17 = vsub.f32 %v2550_v18, %v3175_v46  ;;  %v2623_v33 = vpop.permute.xlu1 %70 }
  0x96   :  { %3208 = vst [vmem:[#allocation23_spill] sm:$0xff] %v2587_v63  ;;  %1898 = vmatprep.subr.mxu1 %v2206_v37  ;;  %1835 = vmatpush3.msra.mxu0 %v2163_v22  ;;  %vm90_vm12 = vcmp.eq.s32.totalorder %v2393_v45, %v2587_v63  ;;  %v296_v22 = vsub.f32 %v2544_v54, %v3174_v58  ;;  %v3181_v58 = vand.u32 4294901760, %v2590_v20  ;;  %v3180_v46 = vand.u32 4294901760, %v2596_v21 }
  0x97   :  { %1899 = vmatpush3.msra.mxu1 %v2206_v37  ;;  %1836 = vmatprep.subr.mxu0 %v2187_v30  ;;  %v1472_v28 = vsel %vm90_vm12, 1.0, %v3197_v32  ;;  %vm91_vm13 = vcmp.eq.s32.totalorder %v2393_v45, %v2623_v33 }
  0x98   :  { %1817 = vmatmul.mubr.msk.f32.gmra.mxu1 %vm87_vm9, %v3198_v5  ;;  %1900 = vmatprep.subr.mxu1 %v2230_v47  ;;  %v2640_v35 = vsub.f32 %v1472_v28, %v1472_v28  ;;  %v1473_v19 = vsel %vm91_vm13, 1.0, %v3197_v32 }
  0x99   :  { %1755 = vmatmul.mubr.f32.gmra.mxu0 %v277_v53  ;;  %1819 = vmatprep.mubr.msk.f32.mxu1 %vm88_vm10, %v3198_v5  ;;  %v2629_v53 = vpop.permute.xlu0 %73 }
  0x9a   :  { %1837 = vmatpush3.msra.mxu0 %v2187_v30  ;;  %1901 = vmatpush3.msra.mxu1 %v2230_v47  ;;  %v297_v30 = vand.u32 4294901760, %v296_v22  ;;  %vm92_vm14 = vcmp.eq.s32.totalorder %v2393_v45, %v2629_v53  ;;  %v326_v22 = vsub.f32 %v2596_v21, %v3180_v46  ;;  %v345_v46 = vand.u32 4294901760, %v2640_v35 }
  0x9b   :  { %1757 = vmatprep.mubr.f32.mxu0 %v287_v13  ;;  %1838 = vmatprep.subr.mxu0 %v2203_v36  ;;  %v307_v13 = vand.u32 4294901760, %v306_v17  ;;  %v2667_v17 = vpop.permute.xlu1 %76  ;;  %v1474_v28 = vsel %vm92_vm14, 1.0, %v3197_v32 }
  0x9c   :  { %1902 = vmatprep.subr.mxu1 %v2242_v52  ;;  %1839 = vmatpush3.msra.mxu0 %v2203_v36  ;;  %v316_v36 = vsub.f32 %v2590_v20, %v3181_v58  ;;  %v2678_v58 = vsub.f32 %v1473_v19, %v1473_v19  ;;  %vm93_vm15 = vcmp.eq.s32.totalorder %v2393_v45, %v2667_v17 }
  0x9d   :  { %1903 = vmatpush3.msra.mxu1 %v2242_v52  ;;  %1840 = vmatprep.subr.mxu0 %v2221_v44  ;;  %v2682_v63 = vsub.f32 %v1474_v28, %v1474_v28 }
  0x9e   :  { %1820 = vmatmul.mubr.msk.f32.gmra.mxu1 %vm89_vm11, %v3198_v5  ;;  %1904 = vmatprep.subr.mxu1 %v2263_v60  ;;  %v355_v19 = vand.u32 4294901760, %v2678_v58 }
  0x9f   :  { %1758 = vmatmul.mubr.f32.gmra.mxu0 %v297_v30  ;;  %1822 = vmatprep.mubr.msk.f32.mxu1 %vm90_vm12, %v3198_v5  ;;  %v335_v30 = vand.u32 4294901760, %v2634_v3  ;;  %v365_v28 = vand.u32 4294901760, %v2682_v63 }
  0xa0   :  { %1841 = vmatpush3.msra.mxu0 %v2221_v44  ;;  %1905 = vmatpush3.msra.mxu1 %v2263_v60  ;;  %v317_v44 = vand.u32 4294901760, %v316_v36  ;;  %v346_v36 = vsub.f32 %v2640_v35, %v345_v46 }
  0xa1   :  { %1760 = vmatprep.mubr.f32.mxu0 %v307_v13  ;;  %1842 = vmatprep.subr.mxu0 %v2236_v50  ;;  %v327_v13 = vand.u32 4294901760, %v326_v22  ;;  %v1475_v22 = vsel %vm93_vm15, 1.0, %v3197_v32 }
  0xa2   :  { %1906 = vmatprep.subr.mxu1 %v2277_v1  ;;  %1843 = vmatpush3.msra.mxu0 %v2236_v50  ;;  %v336_v50 = vsub.f32 %v2634_v3, %v335_v30  ;;  %v347_v32 = vand.u32 4294901760, %v346_v36 }
  0xa3   :  { %1907 = vmatpush3.msra.mxu1 %v2277_v1  ;;  %1844 = vmatprep.subr.mxu0 %v2260_v59 }
  0xa4   :  { %1823 = vmatmul.mubr.msk.f32.gmra.mxu1 %vm91_vm13, %v3198_v5  ;;  %1908 = vmatprep.subr.mxu1 %v2298_v11 }
  0xa5   :  { %1761 = vmatmul.mubr.f32.gmra.mxu0 %v317_v44  ;;  %1825 = vmatprep.mubr.msk.f32.mxu1 %vm92_vm14, %v3198_v5  ;;  %v2712_v44 = vsub.f32 %v1475_v22, %v1475_v22 }
  0xa6   :  { %1845 = vmatpush3.msra.mxu0 %v2260_v59  ;;  %1909 = vmatpush3.msra.mxu1 %v2298_v11  ;;  %v337_v59 = vand.u32 4294901760, %v336_v50  ;;  %v3209_v50 = vand.u32 4294901760, %v2415_v6 }
  0xa7   :  { %1763 = vmatprep.mubr.f32.mxu0 %v327_v13  ;;  %1846 = vmatprep.subr.mxu0 %v2275_v0  ;;  %v366_v13 = vsub.f32 %v2682_v63, %v365_v28  ;;  %v375_v36 = vand.u32 4294901760, %v2712_v44 }
  0xa8   :  { %1910 = vmatprep.subr.mxu1 %v2312_v27  ;;  %1847 = vmatpush3.msra.mxu0 %v2275_v0  ;;  %v356_v0 = vsub.f32 %v2678_v58, %v355_v19 }
  0xa9   :  { %1911 = vmatpush3.msra.mxu1 %v2312_v27  ;;  %1848 = vmatprep.subr.mxu0 %v2296_v10 }
  0xaa   :  { %1826 = vmatmul.mubr.msk.f32.gmra.mxu1 %vm93_vm15, %v3198_v5  ;;  %1912 = vmatprep.subr.mxu1 %v2333_v41  ;;  %v357_v22 = vand.u32 4294901760, %v356_v0  ;;  %v3212_v0 = vand.u32 4294901760, %v2450_v61 }
  0xab   :  { %1764 = vmatmul.mubr.f32.gmra.mxu0 %v337_v59  ;;  %1913 = vmatpush3.msra.mxu1 %v2333_v41  ;;  %v367_v59 = vand.u32 4294901760, %v366_v13 }
  0xac   :  { %1849 = vmatpush3.msra.mxu0 %v2296_v10  ;;  %1916 = vmatprep.mubr.f32.mxu1 %v3209_v50  ;;  %v3210_v10 = vand.u32 4294901760, %v2440_v38  ;;  %v376_v50 = vsub.f32 %v2712_v44, %v375_v36 }
  0xad   :  { %1766 = vmatprep.mubr.f32.mxu0 %v347_v32  ;;  %1850 = vmatprep.subr.mxu0 %v2310_v26  ;;  %v3211_v32 = vand.u32 4294901760, %v2417_v12 }
  0xae   :  { %1914 = vmatprep.subr.mxu1 %v2344_v51  ;;  %1851 = vmatpush3.msra.mxu0 %v2310_v26  ;;  %v377_v26 = vand.u32 4294901760, %v376_v50 }
  0xaf   :  { %1915 = vmatpush3.msra.mxu1 %v2344_v51  ;;  %1852 = vmatprep.subr.mxu0 %v2331_v40 }
  0xb0   :  { %1917 = vmatmul.mubr.f32.vlgmr.msra.gmra.mxu1 %v3210_v10  ;;  %1996 = vmatprep.subr.mxu1 %v2121_v7 }
  0xb1   :  { %1767 = vmatmul.mubr.f32.gmra.mxu0 %v357_v22  ;;  %1919 = vmatprep.mubr.f32.mxu1 %v3211_v32 }
  0xb2   :  { %1853 = vmatpush3.msra.mxu0 %v2331_v40  ;;  %1997 = vmatpush3.msra.mxu1 %v2121_v7  ;;  %v3213_v7 = vand.u32 4294901760, %v2477_v42 }
  0xb3   :  { %1769 = vmatprep.mubr.f32.mxu0 %v367_v59  ;;  %1854 = vmatprep.subr.mxu0 %v2342_v48 }
  0xb4   :  { %1998 = vmatprep.subr.mxu1 %v2123_v8  ;;  %1855 = vmatpush3.msra.mxu0 %v2342_v48 }
  0xb5   :  { %1999 = vmatpush3.msra.mxu1 %v2123_v8  ;;  %1856 = vmatprep.subr.mxu0 %v2354_v57  ;;  %v3214_v8 = vand.u32 4294901760, %v2501_v55 }
  0xb6   :  { %1920 = vmatmul.mubr.f32.gmra.mxu1 %v3212_v0  ;;  %2000 = vmatprep.subr.mxu1 %v2140_v14 }
  0xb7   :  { %1770 = vmatmul.mubr.f32.gmra.mxu0 %v377_v26  ;;  %1922 = vmatprep.mubr.f32.mxu1 %v3213_v7 }
  0xb8   :  { %1857 = vmatpush3.msra.mxu0 %v2354_v57  ;;  %2001 = vmatpush3.msra.mxu1 %v2140_v14  ;;  %v3215_v14 = vand.u32 4294901760, %v2508_v4 }
  0xb9   :  { %1858 = vmatprep.subr.mxu0 %v2364_v2  ;;  %1860 = vmatprep.mubr.f32.mxu0 %v2415_v6 }
  0xba   :  { %2002 = vmatprep.subr.mxu1 %v2142_v15  ;;  %1859 = vmatpush3.msra.mxu0 %v2364_v2 }
  0xbb   :  { %2003 = vmatpush3.msra.mxu1 %v2142_v15  ;;  %1940 = vmatprep.subr.mxu0 %v2169_v24  ;;  %v3216_v15 = vand.u32 4294901760, %v2544_v54 }
  0xbc   :  { %1923 = vmatmul.mubr.f32.gmra.mxu1 %v3214_v8  ;;  %2004 = vmatprep.subr.mxu1 %v2144_v16 }
  0xbd   :  { %1861 = vmatmul.mubr.f32.vlgmr.msra.gmra.mxu0 %v2440_v38  ;;  %1925 = vmatprep.mubr.f32.mxu1 %v3215_v14 }
  0xbe   :  { %1941 = vmatpush3.msra.mxu0 %v2169_v24  ;;  %2005 = vmatpush3.msra.mxu1 %v2144_v16  ;;  %v3217_v16 = vand.u32 4294901760, %v2550_v18  ;;  %v3219_v24 = vand.u32 4294901760, %v2596_v21 }
  0xbf   :  { %1863 = vmatprep.mubr.f32.mxu0 %v2417_v12  ;;  %1942 = vmatprep.subr.mxu0 %v2172_v25 }
  0xc0   :  { %2006 = vmatprep.subr.mxu1 %v2166_v23  ;;  %1943 = vmatpush3.msra.mxu0 %v2172_v25  ;;  %v3220_v25 = vld [vmem:[#allocation5_spill] sm:$0xff] }
  0xc1   :  { %2007 = vmatpush3.msra.mxu1 %v2166_v23  ;;  %1944 = vmatprep.subr.mxu0 %v2184_v29  ;;  %v3218_v23 = vand.u32 4294901760, %v2590_v20 }
  0xc2   :  { %1926 = vmatmul.mubr.f32.gmra.mxu1 %v3216_v15  ;;  %2008 = vmatprep.subr.mxu1 %v2190_v31 }
  0xc3   :  { %1864 = vmatmul.mubr.f32.gmra.mxu0 %v2450_v61  ;;  %1928 = vmatprep.mubr.f32.mxu1 %v3217_v16 }
  0xc4   :  { %1945 = vmatpush3.msra.mxu0 %v2184_v29  ;;  %2009 = vmatpush3.msra.mxu1 %v2190_v31  ;;  %v3221_v29 = vld [vmem:[#allocation6_spill] sm:$0xff] }
  0xc5   :  { %1866 = vmatprep.mubr.f32.mxu0 %v2477_v42  ;;  %1946 = vmatprep.subr.mxu0 %v2197_v34 }
  0xc6   :  { %2010 = vmatprep.subr.mxu1 %v2206_v37  ;;  %1947 = vmatpush3.msra.mxu0 %v2197_v34  ;;  %v3223_v34 = vld [vmem:[#allocation7_spill] sm:$0xff] }
  0xc7   :  { %2011 = vmatpush3.msra.mxu1 %v2206_v37  ;;  %1948 = vmatprep.subr.mxu0 %v2218_v43  ;;  %v3224_v37 = vld [vmem:[#allocation8_spill] sm:$0xff] }
  0xc8   :  { %1929 = vmatmul.mubr.f32.gmra.mxu1 %v3218_v23  ;;  %2012 = vmatprep.subr.mxu1 %v2230_v47 }
  0xc9   :  { %1867 = vmatmul.mubr.f32.gmra.mxu0 %v2501_v55  ;;  %1931 = vmatprep.mubr.f32.mxu1 %v3219_v24 }
  0xca   :  { %1949 = vmatpush3.msra.mxu0 %v2218_v43  ;;  %2013 = vmatpush3.msra.mxu1 %v2230_v47 }
  0xcb   :  { %1869 = vmatprep.mubr.f32.mxu0 %v2508_v4  ;;  %1950 = vmatprep.subr.mxu0 %v2233_v49 }
  0xcc   :  { %2014 = vmatprep.subr.mxu1 %v2242_v52  ;;  %1951 = vmatpush3.msra.mxu0 %v2233_v49  ;;  %v3227_v49 = vld [vmem:[#allocation9_spill] sm:$0xff] }
  0xcd   :  { %2015 = vmatpush3.msra.mxu1 %v2242_v52  ;;  %1952 = vmatprep.subr.mxu0 %v2253_v56  ;;  %v3228_v52 = vld [vmem:[#allocation10_spill] sm:$0xff] }
  0xce   :  { %1932 = vmatmul.mubr.f32.gmra.mxu1 %v335_v30  ;;  %2016 = vmatprep.subr.mxu1 %v2263_v60 }
  0xcf   :  { %1870 = vmatmul.mubr.f32.gmra.mxu0 %v2544_v54  ;;  %1934 = vmatprep.mubr.f32.mxu1 %v345_v46 }
  0xd0   :  { %1953 = vmatpush3.msra.mxu0 %v2253_v56  ;;  %2017 = vmatpush3.msra.mxu1 %v2263_v60 }
  0xd1   :  { %1872 = vmatprep.mubr.f32.mxu0 %v2550_v18  ;;  %1954 = vmatprep.subr.mxu0 %v2268_v62 }
  0xd2   :  { %2018 = vmatprep.subr.mxu1 %v2277_v1  ;;  %1955 = vmatpush3.msra.mxu0 %v2268_v62  ;;  %v3231_v62 = vld [vmem:[#allocation11_spill] sm:$0xff] }
  0xd3   :  { %2019 = vmatpush3.msra.mxu1 %v2277_v1  ;;  %1956 = vmatprep.subr.mxu0 %v2292_v9 }
  0xd4   :  { %1935 = vmatmul.mubr.f32.gmra.mxu1 %v355_v19  ;;  %2020 = vmatprep.subr.mxu1 %v2298_v11 }
  0xd5   :  { %1873 = vmatmul.mubr.f32.gmra.mxu0 %v2590_v20  ;;  %1937 = vmatprep.mubr.f32.mxu1 %v365_v28 }
  0xd6   :  { %1957 = vmatpush3.msra.mxu0 %v2292_v9  ;;  %2021 = vmatpush3.msra.mxu1 %v2298_v11 }
  0xd7   :  { %1875 = vmatprep.mubr.f32.mxu0 %v2596_v21  ;;  %1958 = vmatprep.subr.mxu0 %v3220_v25 }
  0xd8   :  { %2022 = vmatprep.subr.mxu1 %v2312_v27  ;;  %1959 = vmatpush3.msra.mxu0 %v3220_v25 }
  0xd9   :  { %2023 = vmatpush3.msra.mxu1 %v2312_v27  ;;  %1960 = vmatprep.subr.mxu0 %v3221_v29 }
  0xda   :  { %1938 = vmatmul.mubr.f32.gmra.mxu1 %v375_v36  ;;  %2024 = vmatprep.subr.mxu1 %v2333_v41 }
  0xdb   :  { %1876 = vmatmul.mubr.f32.gmra.mxu0 %v2634_v3  ;;  %2025 = vmatpush3.msra.mxu1 %v2333_v41 }
  0xdc   :  { %1961 = vmatpush3.msra.mxu0 %v3221_v29  ;;  %2028 = vmatprep.mubr.msk.f32.mxu1 %vm78_vm1, %v3198_v5 }
  0xdd   :  { %1878 = vmatprep.mubr.f32.mxu0 %v2640_v35  ;;  %1962 = vmatprep.subr.mxu0 %v3223_v34 }
  0xde   :  { %2026 = vmatprep.subr.mxu1 %v2344_v51  ;;  %1963 = vmatpush3.msra.mxu0 %v3223_v34 }
  0xdf   :  { %2027 = vmatpush3.msra.mxu1 %v2344_v51  ;;  %1964 = vmatprep.subr.mxu0 %v3224_v37 }
  0xe0   :  { %2029 = vmatmul.mubr.msk.f32.vlgmr.msra.gmra.mxu1 %vm79_vm3, %v3198_v5  ;;  %1879 = vmatmul.mubr.f32.gmra.mxu0 %v2678_v58 }
  0xe1   :  { %1965 = vmatpush3.msra.mxu0 %v3224_v37  ;;  %2031 = vmatprep.mubr.msk.f32.mxu1 %vm80_vm0, %v3198_v5 }
  0xe2   :  { %1881 = vmatprep.mubr.f32.mxu0 %v2682_v63  ;;  %1966 = vmatprep.subr.mxu0 %v3227_v49 }
  0xe3   :  { %1967 = vmatpush3.msra.mxu0 %v3227_v49 }
  0xe4   :  { %1968 = vmatprep.subr.mxu0 %v3228_v52  ;;  %2032 = vmatmul.mubr.msk.f32.gmra.mxu1 %vm81_vm2, %v3198_v5 }
  0xe5   :  { %1882 = vmatmul.mubr.f32.gmra.mxu0 %v2712_v44  ;;  %2034 = vmatprep.mubr.msk.f32.mxu1 %vm82_vm5, %v3198_v5 }
  0xe6   :  { %1969 = vmatpush3.msra.mxu0 %v3228_v52  ;;  %1972 = vmatprep.mubr.msk.f32.mxu0 %vm78_vm1, %v3198_v5 }
  0xe7   :  { %1970 = vmatprep.subr.mxu0 %v3231_v62 }
  0xe8   :  { %1971 = vmatpush3.msra.mxu0 %v3231_v62  ;;  %2035 = vmatmul.mubr.msk.f32.gmra.mxu1 %vm83_vm4, %v3198_v5 }
  0xe9   :  { %1973 = vmatmul.mubr.msk.f32.vlgmr.msra.gmra.mxu0 %vm79_vm3, %v3198_v5  ;;  %2037 = vmatprep.mubr.msk.f32.mxu1 %vm84_vm7, %v3198_v5 }
  0xea   :  { %1975 = vmatprep.mubr.msk.f32.mxu0 %vm80_vm0, %v3198_v5 }
  0xec   :  { %2038 = vmatmul.mubr.msk.f32.gmra.mxu1 %vm85_vm6, %v3198_v5 }
  0xed   :  { %1976 = vmatmul.mubr.msk.f32.gmra.mxu0 %vm81_vm2, %v3198_v5  ;;  %2040 = vmatprep.mubr.msk.f32.mxu1 %vm86_vm8, %v3198_v5 }
  0xee   :  { %1978 = vmatprep.mubr.msk.f32.mxu0 %vm82_vm5, %v3198_v5 }
  0xf0   :  { %2041 = vmatmul.mubr.msk.f32.gmra.mxu1 %vm87_vm9, %v3198_v5 }
  0xf1   :  { %1979 = vmatmul.mubr.msk.f32.gmra.mxu0 %vm83_vm4, %v3198_v5  ;;  %2043 = vmatprep.mubr.msk.f32.mxu1 %vm88_vm10, %v3198_v5 }
  0xf2   :  { %1981 = vmatprep.mubr.msk.f32.mxu0 %vm84_vm7, %v3198_v5 }
  0xf4   :  { %2044 = vmatmul.mubr.msk.f32.gmra.mxu1 %vm89_vm11, %v3198_v5 }
  0xf5   :  { %1982 = vmatmul.mubr.msk.f32.gmra.mxu0 %vm85_vm6, %v3198_v5  ;;  %2046 = vmatprep.mubr.msk.f32.mxu1 %vm90_vm12, %v3198_v5 }
  0xf6   :  { %1984 = vmatprep.mubr.msk.f32.mxu0 %vm86_vm8, %v3198_v5 }
  0xf8   :  { %2047 = vmatmul.mubr.msk.f32.gmra.mxu1 %vm91_vm13, %v3198_v5 }
  0xf9   :  { %1985 = vmatmul.mubr.msk.f32.gmra.mxu0 %vm87_vm9, %v3198_v5  ;;  %2049 = vmatprep.mubr.msk.f32.mxu1 %vm92_vm14, %v3198_v5 }
  0xfa   :  { %1987 = vmatprep.mubr.msk.f32.mxu0 %vm88_vm10, %v3198_v5 }
  0xfc   :  { %2050 = vmatmul.mubr.msk.f32.gmra.mxu1 %vm93_vm15, %v3198_v5 }
  0xfd   :  { %1988 = vmatmul.mubr.msk.f32.gmra.mxu0 %vm89_vm11, %v3198_v5 }
  0xfe   :  { %1990 = vmatprep.mubr.msk.f32.mxu0 %vm90_vm12, %v3198_v5 }
 0x101   :  { %1991 = vmatmul.mubr.msk.f32.gmra.mxu0 %vm91_vm13, %v3198_v5 }
 0x102   :  { %1993 = vmatprep.mubr.msk.f32.mxu0 %vm92_vm14, %v3198_v5 }
 0x105   :  { %1994 = vmatmul.mubr.msk.f32.gmra.mxu0 %vm93_vm15, %v3198_v5 }
 0x143   :  { %v1806_v48 = vpop.f32.mrf.mxu1 }
 0x145   :  { %v2985_v51 = vpop.f32.mrf.mxu1 }
 0x147   :  { %v2987_v55 = vpop.f32.mrf.mxu1 }
 0x149   :  { %v2989_v57 = vpop.f32.mrf.mxu1 }
 0x14c   :  { %v2991_v63 = vpop.f32.mrf.mxu1 }
 0x14d   :  { %v1750_v2 = vpop.f32.mrf.mxu0 }
 0x14e   :  { %v2993_v58 = vpop.f32.mrf.mxu1  ;;  %v537_v40 = vadd.f32 %v1806_v48, %v1750_v2 }
 0x14f   :  { %v229_v6 = vpop.f32.mrf.mxu0 }
 0x152   :  { %v2995_v12 = vpop.f32.mrf.mxu1 }
 0x153   :  { %v1753_v38 = vpop.f32.mrf.mxu0 }
 0x154   :  { %v2997_v61 = vpop.f32.mrf.mxu1 }
 0x155   :  { %v249_v45 = vpop.f32.mrf.mxu0 }
 0x158   :  { %v2999_v5 = vpop.f32.mrf.mxu1 }
 0x159   :  { %v3001_v42 = vpop.f32.mrf.mxu0 }
 0x15a   :  { %v3003_v4 = vpop.f32.mrf.mxu1 }
 0x15b   :  { %v3005_v35 = vpop.f32.mrf.mxu0 }
 0x15e   :  { %v3007_v3 = vpop.f32.mrf.mxu1 }
 0x15f   :  { %v3009_v54 = vpop.f32.mrf.mxu0 }
 0x160   :  { %v3011_v18 = vpop.f32.mrf.mxu1 }
 0x161   :  { %v3013_v39 = vpop.f32.mrf.mxu0 }
 0x164   :  { %v3015_v46 = vpop.f32.mrf.mxu1 }
 0x165   :  { %v3017_v21 = vpop.f32.mrf.mxu0 }
 0x166   :  { %v3019_v33 = vpop.f32.mrf.mxu1 }
 0x167   :  { %3239 = vst [vmem:[#allocation5_spill] sm:$0xff] %v3019_v33  ;;  %v3021_v53 = vpop.f32.mrf.mxu0 }
 0x16a   :  { %v3023_v17 = vpop.f32.mrf.mxu1 }
 0x16b   :  { %3240 = vst [vmem:[#allocation6_spill] sm:$0xff] %v3023_v17  ;;  %v3025_v30 = vpop.f32.mrf.mxu0 }
 0x16c   :  { %v3027_v19 = vpop.f32.mrf.mxu1 }
 0x16d   :  { %3241 = vst [vmem:[#allocation13_spill] sm:$0xff] %v3027_v19  ;;  %v3029_v28 = vpop.f32.mrf.mxu0  ;;  %v531_v19 = vadd.f32 %v2985_v51, %v229_v6 }
 0x170   :  { %v1918_v44 = vpop.f32.mrf.mxu1 }
 0x171   :  { %v3031_v13 = vpop.f32.mrf.mxu0 }
 0x172   :  { %v918_v36 = vpop.f32.mrf.mxu1 }
 0x173   :  { %v3033_v22 = vpop.f32.mrf.mxu0 }
 0x176   :  { %v1921_v59 = vpop.f32.mrf.mxu1 }
 0x177   :  { %v3035_v10 = vpop.f32.mrf.mxu0 }
 0x178   :  { %3242 = vst [vmem:[#allocation7_spill] sm:$0xff] %v3035_v10  ;;  %v3037_v32 = vpop.f32.mrf.mxu1 }
 0x179   :  { %v3039_v50 = vpop.f32.mrf.mxu0 }
 0x17a   :  { %3243 = vst [vmem:[#allocation8_spill] sm:$0xff] %v3039_v50 }
 0x17c   :  { %v3041_v26 = vpop.f32.mrf.mxu1 }
 0x17d   :  { %v1862_v0 = vpop.f32.mrf.mxu0 }
 0x17e   :  { %v3043_v7 = vpop.f32.mrf.mxu1 }
 0x17f   :  { %v724_v8 = vpop.f32.mrf.mxu0 }
 0x180   :  { %v725_v17 = vadd.f32 %v724_v8, %v531_v19 }
 0x182   :  { %v3045_v14 = vpop.f32.mrf.mxu1 }
 0x183   :  { %v1865_v15 = vpop.f32.mrf.mxu0 }
 0x184   :  { %v3047_v16 = vpop.f32.mrf.mxu1 }
 0x185   :  { %v738_v23 = vpop.f32.mrf.mxu0 }
 0x188   :  { %v3049_v24 = vpop.f32.mrf.mxu1 }
 0x189   :  { %v1868_v25 = vpop.f32.mrf.mxu0 }
 0x18a   :  { %v3051_v29 = vpop.f32.mrf.mxu1 }
 0x18b   :  { %v752_v31 = vpop.f32.mrf.mxu0 }
 0x18e   :  { %v3053_v34 = vpop.f32.mrf.mxu1 }
 0x18f   :  { %3244 = vst [vmem:[#allocation15_spill] sm:$0xff] %v3053_v34  ;;  %v1871_v37 = vpop.f32.mrf.mxu0  ;;  %v543_v34 = vadd.f32 %v2989_v57, %v249_v45  ;;  %v573_v45 = vadd.f32 %v2995_v12, %v3009_v54  ;;  %v585_v12 = vadd.f32 %v2999_v5, %v3017_v21  ;;  %v597_v5 = vadd.f32 %v3007_v3, %v3025_v30 }
 0x190   :  { %v3055_v43 = vpop.f32.mrf.mxu1  ;;  %v609_v30 = vadd.f32 %v3015_v46, %v3031_v13  ;;  %v3257_v13 = vld [vmem:[#allocation7_spill] sm:$0xff] }
 0x191   :  { %3245 = vst [vmem:[#allocation12_spill] sm:$0xff] %v3055_v43  ;;  %v766_v47 = vpop.f32.mrf.mxu0  ;;  %v739_v51 = vadd.f32 %v738_v23, %v543_v34 }
 0x194   :  { %v3057_v49 = vpop.f32.mrf.mxu1 }
 0x195   :  { %3246 = vst [vmem:[#allocation9_spill] sm:$0xff] %v3057_v49  ;;  %v3059_v52 = vpop.f32.mrf.mxu0 }
 0x196   :  { %v3061_v56 = vpop.f32.mrf.mxu1 }
 0x197   :  { %3247 = vst [vmem:[#allocation10_spill] sm:$0xff] %v3061_v56  ;;  %v3063_v60 = vpop.f32.mrf.mxu0  ;;  %v732_v56 = vadd.f32 %v1862_v0, %v537_v40  ;;  %v919_v40 = vadd.f32 %v918_v36, %v725_v17  ;;  %v935_v17 = vadd.f32 %v3037_v32, %v739_v51  ;;  %v774_v36 = vadd.f32 %v1871_v37, %v573_v45 }
 0x199   :  { %v927_v48 = vadd.f32 %v1918_v44, %v732_v56 }
 0x19a   :  { %v3065_v62 = vpop.f32.mrf.mxu1 }
 0x19b   :  { %3248 = vst [vmem:[#allocation14_spill] sm:$0xff] %v3065_v62  ;;  %v3067_v1 = vpop.f32.mrf.mxu0  ;;  %v549_v62 = vadd.f32 %v2987_v55, %v1753_v38  ;;  %v555_v55 = vadd.f32 %v2993_v58, %v3005_v35  ;;  %v567_v58 = vadd.f32 %v2997_v61, %v3013_v39  ;;  %v579_v61 = vadd.f32 %v3003_v4, %v3021_v53 }
 0x19c   :  { %v3069_v9 = vpop.f32.mrf.mxu1  ;;  %v591_v53 = vadd.f32 %v3011_v18, %v3029_v28  ;;  %v3254_v28 = vld [vmem:[#allocation5_spill] sm:$0xff] }
 0x19d   :  { %3249 = vst [vmem:[#allocation17_spill] sm:$0xff] %v3069_v9  ;;  %v3071_v11 = vpop.f32.mrf.mxu0  ;;  %v746_v33 = vadd.f32 %v1865_v15, %v549_v62  ;;  %v753_v15 = vadd.f32 %v752_v31, %v555_v55  ;;  %v767_v31 = vadd.f32 %v766_v47, %v567_v58  ;;  %v781_v47 = vadd.f32 %v3063_v60, %v579_v61  ;;  %v3256_v55 = vld [vmem:[#allocation15_spill] sm:$0xff] }
 0x19f   :  { %v943_v57 = vadd.f32 %v1921_v59, %v746_v33  ;;  %v951_v62 = vadd.f32 %v3043_v7, %v753_v15  ;;  %v967_v4 = vadd.f32 %v3047_v16, %v767_v31  ;;  %v983_v18 = vadd.f32 %v3051_v29, %v781_v47  ;;  %v3260_v15 = vld [vmem:[#allocation12_spill] sm:$0xff] }
 0x1a0   :  { %v2030_v20 = vpop.f32.mrf.mxu1  ;;  %v3073_v27 = vpop.f32.mrf.mxu0 }
 0x1a1   :  { %3250 = vst [vmem:[#allocation11_spill] sm:$0xff] %v3073_v27 }
 0x1a2   :  { %v1334_v41 = vpop.f32.mrf.mxu1  ;;  %v3075_v49 = vpop.f32.mrf.mxu0 }
 0x1a3   :  { %3251 = vst [vmem:[#allocation16_spill] sm:$0xff] %v3075_v49  ;;  %v561_v49 = vadd.f32 %v2991_v63, %v3001_v42 }
 0x1a4   :  { %v2033_v50 = vpop.f32.mrf.mxu1  ;;  %v3268_v47 = vld [vmem:[#allocation17_spill] sm:$0xff] }
 0x1a5   :  { %v3078_v43 = vpop.f32.mrf.mxu0  ;;  %v760_v19 = vadd.f32 %v1868_v25, %v561_v49 }
 0x1a6   :  { %3252 = vst [vmem:[#allocation19_spill] sm:$0xff] %v3078_v43  ;;  %v1346_v10 = vpop.f32.mrf.mxu1 }
 0x1a7   :  { %v3081_v9 = vpop.f32.mrf.mxu0  ;;  %v959_v59 = vadd.f32 %v3041_v26, %v760_v19 }
 0x1a8   :  { %3253 = vst [vmem:[#allocation18_spill] sm:$0xff] %v3081_v9  ;;  %v2036_v27 = vpop.f32.mrf.mxu1 }
 0x1a9   :  { %v1974_v2 = vpop.f32.mrf.mxu0 }
 0x1aa   :  { %v1164_v6 = vadd.f32 %v1974_v2, %v927_v48  ;;  %v1358_v0 = vpop.f32.mrf.mxu1  ;;  %v795_v2 = vadd.f32 %v3071_v11, %v591_v53 }
 0x1ab   :  { %v1157_v38 = vpop.f32.mrf.mxu0 }
 0x1ac   :  { %v1341_v8 = vadd.f32 %v2030_v20, %v1164_v6  ;;  %v1158_v9 = vadd.f32 %v1157_v38, %v919_v40  ;;  %v2039_v43 = vpop.f32.mrf.mxu1  ;;  %v3258_v38 = vld [vmem:[#allocation6_spill] sm:$0xff] }
 0x1ad   :  { %v1977_v44 = vpop.f32.mrf.mxu0  ;;  %v621_v19 = vadd.f32 %v3258_v38, %v3257_v13  ;;  %v3263_v58 = vld [vmem:[#allocation19_spill] sm:$0xff] }
 0x1ae   :  { %1429 = vst [vmem:[#allocation2 + $0x8] sm:$0xff] %v1341_v8  ;;  %v1335_v63 = vadd.f32 %v1334_v41, %v1158_v9  ;;  %v1176_v42 = vadd.f32 %v1977_v44, %v943_v57  ;;  %v1370_v23 = vpop.f32.mrf.mxu1  ;;  %v975_v9 = vadd.f32 %v3045_v14, %v774_v36  ;;  %v3259_v57 = vld [vmem:[#allocation16_spill] sm:$0xff] }
 0x1af   :  { %v1169_v35 = vpop.f32.mrf.mxu0 }
 0x1b0   :  { %1428 = vst [vmem:[#allocation2] sm:$0xff] %v1335_v63  ;;  %v1353_v25 = vadd.f32 %v2033_v50, %v1176_v42  ;;  %v1170_v34 = vadd.f32 %v1169_v35, %v935_v17  ;;  %v2042_v33 = vpop.f32.mrf.mxu1  ;;  %v788_v50 = vadd.f32 %v3059_v52, %v585_v12  ;;  %v3261_v63 = vld [vmem:[#allocation8_spill] sm:$0xff]  ;;  %v3262_v42 = vld [vmem:[#allocation13_spill] sm:$0xff]  ;;  %v830_v35 = vadd.f32 %v3263_v58, %v621_v19 }
 0x1b1   :  { %v1980_v54 = vpop.f32.mrf.mxu0 }
 0x1b2   :  { %1431 = vst [vmem:[#allocation2 + $0x18] sm:$0xff] %v1353_v25  ;;  %v1347_v49 = vadd.f32 %v1346_v10, %v1170_v34  ;;  %v1188_v56 = vadd.f32 %v1980_v54, %v959_v59  ;;  %v1382_v32 = vpop.f32.mrf.mxu1  ;;  %v991_v3 = vadd.f32 %v3049_v24, %v788_v50  ;;  %v3264_v34 = vld [vmem:[#allocation9_spill] sm:$0xff]  ;;  %v3265_v54 = vld [vmem:[#allocation18_spill] sm:$0xff] }
 0x1b3   :  { %v1181_v39 = vpop.f32.mrf.mxu0 }
 0x1b4   :  { %1430 = vst [vmem:[#allocation2 + $0x10] sm:$0xff] %v1347_v49  ;;  %v1365_v37 = vadd.f32 %v2036_v27, %v1188_v56  ;;  %v1182_v26 = vadd.f32 %v1181_v39, %v951_v62  ;;  %v2045_v21 = vpop.f32.mrf.mxu1  ;;  %v802_v27 = vadd.f32 %v3067_v1, %v597_v5  ;;  %v603_v1 = vadd.f32 %v3254_v28, %v3033_v22 }
 0x1b5   :  { %v1983_v10 = vpop.f32.mrf.mxu0  ;;  %v999_v22 = vadd.f32 %v3260_v15, %v795_v2 }
 0x1b6   :  { %1433 = vst [vmem:[#allocation2 + $0x28] sm:$0xff] %v1365_v37  ;;  %v1359_v7 = vadd.f32 %v1358_v0, %v1182_v26  ;;  %v1200_v20 = vadd.f32 %v1983_v10, %v975_v9  ;;  %v1394_v60 = vpop.f32.mrf.mxu1  ;;  %v1007_v46 = vadd.f32 %v3256_v55, %v802_v27  ;;  %v809_v45 = vadd.f32 %v3259_v57, %v603_v1  ;;  %v3267_v37 = vld [vmem:[#allocation14_spill] sm:$0xff] }
 0x1b7   :  { %v1193_v52 = vpop.f32.mrf.mxu0  ;;  %v1039_v26 = vadd.f32 %v3267_v37, %v830_v35 }
 0x1b8   :  { %1432 = vst [vmem:[#allocation2 + $0x20] sm:$0xff] %v1359_v7  ;;  %v1377_v14 = vadd.f32 %v2039_v43, %v1200_v20  ;;  %v1194_v41 = vadd.f32 %v1193_v52, %v967_v4  ;;  %v3255_v43 = vld [vmem:[#allocation11_spill] sm:$0xff]  ;;  %v2048_v11 = vpop.f32.mrf.mxu1 }
 0x1b9   :  { %v1986_v48 = vpop.f32.mrf.mxu0  ;;  %v816_v0 = vadd.f32 %v3255_v43, %v609_v30 }
 0x1ba   :  { %1435 = vst [vmem:[#allocation2 + $0x38] sm:$0xff] %v1377_v14  ;;  %v1371_v16 = vadd.f32 %v1370_v23, %v1194_v41  ;;  %v1212_v51 = vadd.f32 %v1986_v48, %v991_v3  ;;  %v615_v23 = vadd.f32 %v3262_v42, %v3261_v63  ;;  %v1406_v59 = vpop.f32.mrf.mxu1 }
 0x1bb   :  { %v1205_v6 = vpop.f32.mrf.mxu0 }
 0x1bc   :  { %1434 = vst [vmem:[#allocation2 + $0x30] sm:$0xff] %v1371_v16  ;;  %v1389_v24 = vadd.f32 %v2042_v33, %v1212_v51  ;;  %v1206_v40 = vadd.f32 %v1205_v6, %v983_v18  ;;  %v1023_v33 = vadd.f32 %v3264_v34, %v816_v0  ;;  %v823_v31 = vadd.f32 %v3265_v54, %v615_v23  ;;  %v2051_v9 = vpop.f32.mrf.mxu1 }
 0x1bd   :  { %v1989_v8 = vpop.f32.mrf.mxu0 }
 0x1be   :  { %1437 = vst [vmem:[#allocation2 + $0x48] sm:$0xff] %v1389_v24  ;;  %v1383_v29 = vadd.f32 %v1382_v32, %v1206_v40  ;;  %v1224_v44 = vadd.f32 %v1989_v8, %v1007_v46  ;;  %v3266_v32 = vld [vmem:[#allocation10_spill] sm:$0xff]  ;;  %v1031_v7 = vadd.f32 %v3268_v47, %v823_v31  ;;  %v1418_v52 = vpop.f32.mrf.mxu1 }
 0x1bf   :  { %v1217_v17 = vpop.f32.mrf.mxu0  ;;  %v1015_v62 = vadd.f32 %v3266_v32, %v809_v45 }
 0x1c0   :  { %1436 = vst [vmem:[#allocation2 + $0x40] sm:$0xff] %v1383_v29  ;;  %v1401_v36 = vadd.f32 %v2045_v21, %v1224_v44  ;;  %v1218_v25 = vadd.f32 %v1217_v17, %v999_v22 }
 0x1c1   :  { %v1992_v12 = vpop.f32.mrf.mxu0 }
 0x1c2   :  { %1439 = vst [vmem:[#allocation2 + $0x58] sm:$0xff] %v1401_v36  ;;  %v1395_v49 = vadd.f32 %v1394_v60, %v1218_v25  ;;  %v1236_v56 = vadd.f32 %v1992_v12, %v1023_v33 }
 0x1c3   :  { %v1229_v61 = vpop.f32.mrf.mxu0 }
 0x1c4   :  { %1438 = vst [vmem:[#allocation2 + $0x50] sm:$0xff] %v1395_v49  ;;  %v1413_v39 = vadd.f32 %v2048_v11, %v1236_v56  ;;  %v1230_v50 = vadd.f32 %v1229_v61, %v1015_v62 }
 0x1c5   :  { %v1995_v5 = vpop.f32.mrf.mxu0 }
 0x1c6   :  { %1441 = vst [vmem:[#allocation2 + $0x68] sm:$0xff] %v1413_v39  ;;  %v1407_v21 = vadd.f32 %v1406_v59, %v1230_v50  ;;  %v1248_v10 = vadd.f32 %v1995_v5, %v1039_v26 }
 0x1c7   :  { %v1241_v20 = vpop.f32.mrf.mxu0 }
 0x1c8   :  { %1440 = vst [vmem:[#allocation2 + $0x60] sm:$0xff] %v1407_v21  ;;  %v1425_v4 = vadd.f32 %v2051_v9, %v1248_v10  ;;  %v1242_v53 = vadd.f32 %v1241_v20, %v1031_v7 }
 0x1ca   :  { %1443 = vst [vmem:[#allocation2 + $0x78] sm:$0xff] %v1425_v4  ;;  %v1419_v27 = vadd.f32 %v1418_v52, %v1242_v53 }
 0x1cc   :  { %1442 = vst [vmem:[#allocation2 + $0x70] sm:$0xff] %v1419_v27 }
 0x1cd   :  { %2071 = shalt.err (!%p2068_p4)
}
 0x1ce   :  { %s2086_s18 = smov 128   ;;  %s2087_s19 = smov 8  }
 0x1cf   :  { %1455 = dma.vmem_to_hbm [thread:$0]  %s1450_s1, 2048, %s3134_s2, [#allocation3], %s2086_s18, %s2086_s18, %s2087_s19  }
 0x1d0   :  { %2080 = dma.done.wait [#allocation3], 2048  }
 0x1d1   :  { %2081 = vsyncadd [#allocation3], 4294965248 }
 0x1d2   :  { %1459 = vsyncpa [#allocation3], 1 }

</bundles_post_ra>
